<compile_context>
chip_gen: v7x
topology: tpu7x:2x2x1
jax: 0.10.0
libtpu: 0.0.40
codegen_flags: <defaults>
</compile_context>

<pallas_src>
import functools

import jax
import jax.numpy as jnp
import numpy as np
from jax.experimental import pallas as pl
from jax.experimental.pallas import tpu as pltpu

K = 7
PAD = (K - 1) // 2  # = 3, "same" padding


def _build_band_weights(conv_w, scale, H, W):
    """Banded lane-shift conv weights: one (2*HW, HW) matrix per depth tap kd.

    B[kd, c*HW + p, q] = scale * conv_w[0, c, kd, kh, kw] where input lane p = hi*W + wi is the
    (kh, kw)-shifted source of output lane q = h*W + w; out-of-range (zero-padded) taps are simply
    absent (structural zeros), so no runtime boundary masking is needed.  One-time host-side
    weight preprocessing.
    """
    HW = H * W
    w = np.asarray(conv_w, np.float32)[0] * float(scale)              # (2, K, K, K)
    b4 = np.zeros((K, 2, HW, HW), np.float32)                         # (kd, c, in_lane, out_lane)
    lane = np.arange(HW)
    h_out, w_out = lane // W, lane % W
    for kh in range(K):
        for kw in range(K):
            hi = h_out + (kh - PAD)
            wi = w_out + (kw - PAD)
            valid = (hi >= 0) & (hi < H) & (wi >= 0) & (wi < W)
            rows = (hi * W + wi)[valid]                                # input lanes
            cols = lane[valid]                                         # output lanes
            b4[:, :, rows, cols] += w[:, :, kh, kw].T[:, :, None]      # (kd, c, n_valid)
    return jnp.asarray(b4.reshape(K, 2 * HW, HW))


def _spatial_gate_kernel(x_ref, b_ref, o_ref, pool_ref, *, bias):
    # x_ref   : (1, C, D, HW)       input slab for one batch element (native dtype).
    # b_ref   : (K, 2*HW, HW) f32   banded conv weights (BN scale + h/w padding folded in).
    # o_ref   : (1, C, D, HW)       gated output slab.
    # pool_ref: (D + 2*PAD, 2*HW)   f32 scratch: depth-winged [max | mean] channel-pool maps.
    D = x_ref.shape[2]
    HW = x_ref.shape[3]

    x = x_ref[0].astype(jnp.float32)                                   # (C, D, HW)

    # --- ChannelPool: cat(max over C, mean over C), staged into the depth-winged scratch ---
    wing = jnp.zeros((PAD, 2 * HW), jnp.float32)
    pool_ref[0:PAD, :] = wing                                          # tiny wing strips only
    pool_ref[PAD + D:PAD + D + PAD, :] = wing
    pool_ref[PAD:PAD + D, 0:HW] = jnp.max(x, axis=0)
    pool_ref[PAD:PAD + D, HW:2 * HW] = jnp.mean(x, axis=0)

    # --- Conv3d(2->1, k=7, pad=3, no bias), BN scale pre-folded: 7 MXU matmuls ---
    # Depth tap kd reads the shifted window (wings supply the depth zero padding); the whole
    # (c, kh, kw) contraction, incl. h/w boundary zeros, lives in the banded matrix b_ref[kd].
    acc = jnp.zeros((D, HW), jnp.float32)
    for kd in range(K):
        acc = acc + jnp.dot(pool_ref[kd:kd + D, :], b_ref[kd],
                            preferred_element_type=jnp.float32)

    # --- folded eval-mode BatchNorm3d bias + ReLU + sigmoid gate ---
    y = jnp.maximum(acc + bias, 0.0)
    gate = pl.reciprocal(1.0 + jnp.exp(-y), approx=True)               # sigmoid; reciprocal on EUP

    # --- gate the original input (broadcast over C); lane-dense (C, D, HW) store ---
    o_ref[0] = (x * gate[None, :, :]).astype(o_ref.dtype)


def spatial_gate(x, conv_w, bn_gamma, bn_beta, bn_mean, bn_var, eps=1e-5):
    N, C, D, H, W = x.shape
    HW = H * W

    # Fold the 1-channel eval-mode BatchNorm3d into the conv taps + one scalar bias (host side).
    scale = np.asarray(bn_gamma, np.float64) / np.sqrt(np.asarray(bn_var, np.float64) + eps)
    bias = float(np.asarray(bn_beta, np.float64)[0]
                 - np.asarray(bn_mean, np.float64)[0] * scale[0])
    b_full = _build_band_weights(conv_w, scale[0], H, W)               # (K, 2*HW, HW) f32

    x_slab = x.reshape(N, C, D, HW)                                    # native dtype, lanes = H*W

    itemsize = x.dtype.itemsize
    blk_bytes = C * D * HW * itemsize
    b_bytes = K * 2 * HW * HW * 4
    scratch_bytes = (D + 2 * PAD) * 2 * HW * 4
    vmem_limit = int(min(4 * blk_bytes + 2 * b_bytes + scratch_bytes + (8 << 20), 64 << 20))

    cost = pl.CostEstimate(
        flops=int(2 * N * K * D * (2 * HW) * HW + 6 * N * C * D * HW),
        transcendentals=int(N * D * HW),
        bytes_accessed=int(2 * N * C * D * HW * itemsize + b_bytes),
    )

    kernel = functools.partial(_spatial_gate_kernel, bias=bias)
    out = pl.pallas_call(
        kernel,
        out_shape=jax.ShapeDtypeStruct((N, C, D, HW), x.dtype),
        grid=(N,),
        in_specs=[
            pl.BlockSpec((1, C, D, HW), lambda n: (n, 0, 0, 0)),       # x slab for batch n
            pl.BlockSpec((K, 2 * HW, HW), lambda n: (0, 0, 0)),        # banded weights (resident)
        ],
        out_specs=pl.BlockSpec((1, C, D, HW), lambda n: (n, 0, 0, 0)),
        scratch_shapes=[pltpu.VMEM((D + 2 * PAD, 2 * HW), jnp.float32)],
        compiler_params=pltpu.CompilerParams(
            dimension_semantics=("parallel",),
            vmem_limit_bytes=vmem_limit,
        ),
        cost_estimate=cost,
    )(x_slab, b_full)
    return out.reshape(N, C, D, H, W)


def spatial_gate_reference(x, conv_w, bn_gamma, bn_beta, bn_mean, bn_var, eps=1e-5):
    """Pure-JAX reference (same math, via lax.conv) for the correctness check."""
    x_max = jnp.max(x, axis=1, keepdims=True)
    x_mean = jnp.mean(x, axis=1, keepdims=True)
    pooled = jnp.concatenate([x_max, x_mean], axis=1)                  # (N, 2, D, H, W)
    y = jax.lax.conv_general_dilated(
        pooled, conv_w, window_strides=(1, 1, 1), padding=[(PAD, PAD)] * 3,
        dimension_numbers=("NCDHW", "OIDHW", "NCDHW"),
        precision=jax.lax.Precision.HIGHEST)
    scale = bn_gamma / jnp.sqrt(bn_var + eps)
    bias = bn_beta - bn_mean * scale
    y = y * scale.reshape(1, -1, 1, 1, 1) + bias.reshape(1, -1, 1, 1, 1)
    y = jnp.maximum(y, 0.0)
    return x * jax.nn.sigmoid(y)


if __name__ == "__main__":
    key = jax.random.PRNGKey(0)
    k_x, k_w = jax.random.split(key)

    # Small shapes consistent with a 5-D (N, C, D, H, W) volumetric input.
    N, C, D, H, W = 2, 4, 8, 8, 8
    x = jax.random.normal(k_x, (N, C, D, H, W), jnp.float32)

    # Conv3d(2, 1, kernel_size=7, bias=False): deterministic uniform init.
    fan_in = 2 * K * K * K
    bound = 1.0 / np.sqrt(fan_in)
    conv_w = jax.random.uniform(k_w, (1, 2, K, K, K), jnp.float32, -bound, bound)

    # BatchNorm3d(1) default parameters (eval mode).
    bn_gamma = jnp.ones((1,), jnp.float32)
    bn_beta = jnp.zeros((1,), jnp.float32)
    bn_mean = jnp.zeros((1,), jnp.float32)
    bn_var = jnp.ones((1,), jnp.float32)

    out = jax.block_until_ready(
        spatial_gate(x, conv_w, bn_gamma, bn_beta, bn_mean, bn_var))
    ref = jax.block_until_ready(
        spatial_gate_reference(x, conv_w, bn_gamma, bn_beta, bn_mean, bn_var))
    np.testing.assert_allclose(np.asarray(out), np.asarray(ref), rtol=2e-3, atol=2e-3)

    print("KERNEL_OK")
</pallas_src>

<mosaic_0001>
module attributes {stable_mosaic.version = 11 : i64} {
  func.func @_spatial_gate_kernel(%arg0: i32, %arg1: memref<1x4x8x64xf32, #tpu.memory_space<vmem>>, %arg2: memref<7x128x64xf32, #tpu.memory_space<vmem>>, %arg3: memref<1x4x8x64xf32, #tpu.memory_space<vmem>>, %arg4: memref<14x128xf32, #tpu.memory_space<vmem>>) attributes {dimension_semantics = [#tpu.dimension_semantics<parallel>], iteration_bounds = array<i64: 2>, scalar_prefetch = 0 : i64, scratch_operands = 1 : i64, tpu.core_type = #tpu.core_type<tc>, window_params = [{transform_indices = @transform_0, window_bounds = array<i64: 1, 4, 8, 64>}, {pipeline_mode = #tpu.pipeline_mode<synchronous>, transform_indices = @transform_1, window_bounds = array<i64: 7, 128, 64>}, {transform_indices = @transform_2, window_bounds = array<i64: 1, 4, 8, 64>}]} {
    %c0 = arith.constant 0 : index
    %c0_0 = arith.constant 0 : index
    %c0_1 = arith.constant 0 : index
    %c0_2 = arith.constant 0 : index
    %0 = vector.load %arg1[%c0, %c0_0, %c0_1, %c0_2] : memref<1x4x8x64xf32, #tpu.memory_space<vmem>>, vector<1x4x8x64xf32>
    %1 = vector.shape_cast %0 : vector<1x4x8x64xf32> to vector<4x8x64xf32>
    %cst = arith.constant 0.000000e+00 : f32
    %2 = vector.broadcast %cst : f32 to vector<3x128xf32>
    %c0_3 = arith.constant 0 : index
    %c0_4 = arith.constant 0 : index
    %3 = vector.load %arg4[%c0_3, %c0_4] : memref<14x128xf32, #tpu.memory_space<vmem>>, vector<3x128xf32>
    tpu.vector_store %arg4[%c0_3, %c0_4], %2 {strides = array<i32>} : memref<14x128xf32, #tpu.memory_space<vmem>>, vector<3x128xf32>,
    %c11 = arith.constant 11 : index
    %c0_5 = arith.constant 0 : index
    %4 = vector.load %arg4[%c11, %c0_5] : memref<14x128xf32, #tpu.memory_space<vmem>>, vector<3x128xf32>
    tpu.vector_store %arg4[%c11, %c0_5], %2 {strides = array<i32>} : memref<14x128xf32, #tpu.memory_space<vmem>>, vector<3x128xf32>,
    %cst_6 = arith.constant dense<0xFF800000> : vector<8x64xf32>
    %5 = vector.multi_reduction <maximumf>, %1, %cst_6 [0] : vector<4x8x64xf32> to vector<8x64xf32>
    %c3 = arith.constant 3 : index
    %c0_7 = arith.constant 0 : index
    %6 = vector.load %arg4[%c3, %c0_7] : memref<14x128xf32, #tpu.memory_space<vmem>>, vector<8x64xf32>
    tpu.vector_store %arg4[%c3, %c0_7], %5 {strides = array<i32>} : memref<14x128xf32, #tpu.memory_space<vmem>>, vector<8x64xf32>,
    %cst_8 = arith.constant dense<0.000000e+00> : vector<8x64xf32>
    %7 = vector.multi_reduction <add>, %1, %cst_8 [0] : vector<4x8x64xf32> to vector<8x64xf32>
    %cst_9 = arith.constant 4.000000e+00 : f32
    %8 = vector.broadcast %cst_9 : f32 to vector<8x64xf32>
    %9 = arith.divf %7, %8 : vector<8x64xf32>
    %c3_10 = arith.constant 3 : index
    %c64 = arith.constant 64 : index
    %10 = vector.load %arg4[%c3_10, %c64] : memref<14x128xf32, #tpu.memory_space<vmem>>, vector<8x64xf32>
    tpu.vector_store %arg4[%c3_10, %c64], %9 {strides = array<i32>} : memref<14x128xf32, #tpu.memory_space<vmem>>, vector<8x64xf32>,
    %cst_11 = arith.constant 0.000000e+00 : f32
    %11 = vector.broadcast %cst_11 : f32 to vector<8x64xf32>
    %c0_12 = arith.constant 0 : index
    %c0_13 = arith.constant 0 : index
    %12 = vector.load %arg4[%c0_12, %c0_13] : memref<14x128xf32, #tpu.memory_space<vmem>>, vector<8x128xf32>
    %c0_14 = arith.constant 0 : index
    %c0_15 = arith.constant 0 : index
    %c0_16 = arith.constant 0 : index
    %13 = vector.load %arg2[%c0_14, %c0_15, %c0_16] : memref<7x128x64xf32, #tpu.memory_space<vmem>>, vector<1x128x64xf32>
    %14 = vector.shape_cast %13 : vector<1x128x64xf32> to vector<128x64xf32>
    %cst_17 = arith.constant dense<0.000000e+00> : vector<8x64xf32>
    %15 = tpu.matmul %12, %14, %cst_17 {dimension_numbers = #tpu.dot_dimension_numbers<[1], [0], [0], [1], [0, 0, 1, 1], [], []>} : vector<8x128xf32>, vector<128x64xf32>, vector<8x64xf32> -> vector<8x64xf32>
    %16 = arith.addf %11, %15 : vector<8x64xf32>
    %c1 = arith.constant 1 : index
    %c0_18 = arith.constant 0 : index
    %17 = vector.load %arg4[%c1, %c0_18] : memref<14x128xf32, #tpu.memory_space<vmem>>, vector<8x128xf32>
    %c1_19 = arith.constant 1 : index
    %c0_20 = arith.constant 0 : index
    %c0_21 = arith.constant 0 : index
    %18 = vector.load %arg2[%c1_19, %c0_20, %c0_21] : memref<7x128x64xf32, #tpu.memory_space<vmem>>, vector<1x128x64xf32>
    %19 = vector.shape_cast %18 : vector<1x128x64xf32> to vector<128x64xf32>
    %cst_22 = arith.constant dense<0.000000e+00> : vector<8x64xf32>
    %20 = tpu.matmul %17, %19, %cst_22 {dimension_numbers = #tpu.dot_dimension_numbers<[1], [0], [0], [1], [0, 0, 1, 1], [], []>} : vector<8x128xf32>, vector<128x64xf32>, vector<8x64xf32> -> vector<8x64xf32>
    %21 = arith.addf %16, %20 : vector<8x64xf32>
    %c2 = arith.constant 2 : index
    %c0_23 = arith.constant 0 : index
    %22 = vector.load %arg4[%c2, %c0_23] : memref<14x128xf32, #tpu.memory_space<vmem>>, vector<8x128xf32>
    %c2_24 = arith.constant 2 : index
    %c0_25 = arith.constant 0 : index
    %c0_26 = arith.constant 0 : index
    %23 = vector.load %arg2[%c2_24, %c0_25, %c0_26] : memref<7x128x64xf32, #tpu.memory_space<vmem>>, vector<1x128x64xf32>
    %24 = vector.shape_cast %23 : vector<1x128x64xf32> to vector<128x64xf32>
    %cst_27 = arith.constant dense<0.000000e+00> : vector<8x64xf32>
    %25 = tpu.matmul %22, %24, %cst_27 {dimension_numbers = #tpu.dot_dimension_numbers<[1], [0], [0], [1], [0, 0, 1, 1], [], []>} : vector<8x128xf32>, vector<128x64xf32>, vector<8x64xf32> -> vector<8x64xf32>
    %26 = arith.addf %21, %25 : vector<8x64xf32>
    %c3_28 = arith.constant 3 : index
    %c0_29 = arith.constant 0 : index
    %27 = vector.load %arg4[%c3_28, %c0_29] : memref<14x128xf32, #tpu.memory_space<vmem>>, vector<8x128xf32>
    %c3_30 = arith.constant 3 : index
    %c0_31 = arith.constant 0 : index
    %c0_32 = arith.constant 0 : index
    %28 = vector.load %arg2[%c3_30, %c0_31, %c0_32] : memref<7x128x64xf32, #tpu.memory_space<vmem>>, vector<1x128x64xf32>
    %29 = vector.shape_cast %28 : vector<1x128x64xf32> to vector<128x64xf32>
    %cst_33 = arith.constant dense<0.000000e+00> : vector<8x64xf32>
    %30 = tpu.matmul %27, %29, %cst_33 {dimension_numbers = #tpu.dot_dimension_numbers<[1], [0], [0], [1], [0, 0, 1, 1], [], []>} : vector<8x128xf32>, vector<128x64xf32>, vector<8x64xf32> -> vector<8x64xf32>
    %31 = arith.addf %26, %30 : vector<8x64xf32>
    %c4 = arith.constant 4 : index
    %c0_34 = arith.constant 0 : index
    %32 = vector.load %arg4[%c4, %c0_34] : memref<14x128xf32, #tpu.memory_space<vmem>>, vector<8x128xf32>
    %c4_35 = arith.constant 4 : index
    %c0_36 = arith.constant 0 : index
    %c0_37 = arith.constant 0 : index
    %33 = vector.load %arg2[%c4_35, %c0_36, %c0_37] : memref<7x128x64xf32, #tpu.memory_space<vmem>>, vector<1x128x64xf32>
    %34 = vector.shape_cast %33 : vector<1x128x64xf32> to vector<128x64xf32>
    %cst_38 = arith.constant dense<0.000000e+00> : vector<8x64xf32>
    %35 = tpu.matmul %32, %34, %cst_38 {dimension_numbers = #tpu.dot_dimension_numbers<[1], [0], [0], [1], [0, 0, 1, 1], [], []>} : vector<8x128xf32>, vector<128x64xf32>, vector<8x64xf32> -> vector<8x64xf32>
    %36 = arith.addf %31, %35 : vector<8x64xf32>
    %c5 = arith.constant 5 : index
    %c0_39 = arith.constant 0 : index
    %37 = vector.load %arg4[%c5, %c0_39] : memref<14x128xf32, #tpu.memory_space<vmem>>, vector<8x128xf32>
    %c5_40 = arith.constant 5 : index
    %c0_41 = arith.constant 0 : index
    %c0_42 = arith.constant 0 : index
    %38 = vector.load %arg2[%c5_40, %c0_41, %c0_42] : memref<7x128x64xf32, #tpu.memory_space<vmem>>, vector<1x128x64xf32>
    %39 = vector.shape_cast %38 : vector<1x128x64xf32> to vector<128x64xf32>
    %cst_43 = arith.constant dense<0.000000e+00> : vector<8x64xf32>
    %40 = tpu.matmul %37, %39, %cst_43 {dimension_numbers = #tpu.dot_dimension_numbers<[1], [0], [0], [1], [0, 0, 1, 1], [], []>} : vector<8x128xf32>, vector<128x64xf32>, vector<8x64xf32> -> vector<8x64xf32>
    %41 = arith.addf %36, %40 : vector<8x64xf32>
    %c6 = arith.constant 6 : index
    %c0_44 = arith.constant 0 : index
    %42 = vector.load %arg4[%c6, %c0_44] : memref<14x128xf32, #tpu.memory_space<vmem>>, vector<8x128xf32>
    %c6_45 = arith.constant 6 : index
    %c0_46 = arith.constant 0 : index
    %c0_47 = arith.constant 0 : index
    %43 = vector.load %arg2[%c6_45, %c0_46, %c0_47] : memref<7x128x64xf32, #tpu.memory_space<vmem>>, vector<1x128x64xf32>
    %44 = vector.shape_cast %43 : vector<1x128x64xf32> to vector<128x64xf32>
    %cst_48 = arith.constant dense<0.000000e+00> : vector<8x64xf32>
    %45 = tpu.matmul %42, %44, %cst_48 {dimension_numbers = #tpu.dot_dimension_numbers<[1], [0], [0], [1], [0, 0, 1, 1], [], []>} : vector<8x128xf32>, vector<128x64xf32>, vector<8x64xf32> -> vector<8x64xf32>
    %46 = arith.addf %41, %45 : vector<8x64xf32>
    %cst_49 = arith.constant 0.000000e+00 : f32
    %47 = vector.broadcast %cst_49 : f32 to vector<8x64xf32>
    %48 = arith.addf %46, %47 : vector<8x64xf32>
    %cst_50 = arith.constant 0.000000e+00 : f32
    %49 = vector.broadcast %cst_50 : f32 to vector<8x64xf32>
    %50 = arith.maximumf %48, %49 : vector<8x64xf32>
    %cst_51 = arith.constant 0.000000e+00 : f32
    %51 = vector.broadcast %cst_51 : f32 to vector<8x64xf32>
    %52 = arith.subf %51, %50 : vector<8x64xf32>
    %53 = math.exp %52 : vector<8x64xf32>
    %cst_52 = arith.constant 1.000000e+00 : f32
    %54 = vector.broadcast %cst_52 : f32 to vector<8x64xf32>
    %55 = arith.addf %54, %53 : vector<8x64xf32>
    %56 = tpu.reciprocal %55 {approx = true} : vector<8x64xf32> -> vector<8x64xf32>
    %57 = vector.shape_cast %56 : vector<8x64xf32> to vector<1x8x64xf32>
    %58 = vector.broadcast %57 : vector<1x8x64xf32> to vector<4x8x64xf32>
    %59 = arith.mulf %1, %58 : vector<4x8x64xf32>
    %c0_53 = arith.constant 0 : index
    %c0_54 = arith.constant 0 : index
    %c0_55 = arith.constant 0 : index
    %c0_56 = arith.constant 0 : index
    %60 = vector.load %arg3[%c0_53, %c0_54, %c0_55, %c0_56] : memref<1x4x8x64xf32, #tpu.memory_space<vmem>>, vector<1x4x8x64xf32>
    %61 = vector.shape_cast %60 : vector<1x4x8x64xf32> to vector<4x8x64xf32>
    %62 = vector.shape_cast %59 : vector<4x8x64xf32> to vector<1x4x8x64xf32>
    tpu.vector_store %arg3[%c0_53, %c0_54, %c0_55, %c0_56], %62 {strides = array<i32>} : memref<1x4x8x64xf32, #tpu.memory_space<vmem>>, vector<1x4x8x64xf32>,
    return
  }
  func.func @transform_0(%arg0: i32) -> (i32, i32, i32, i32) {
    %c0_i32 = arith.constant 0 : i32
    %c0_i32_0 = arith.constant 0 : i32
    %c0_i32_1 = arith.constant 0 : i32
    %c0_i32_2 = arith.constant 0 : i32
    return %arg0, %c0_i32, %c0_i32_0, %c0_i32_1 : i32, i32, i32, i32
  }
  func.func @transform_1(%arg0: i32) -> (i32, i32, i32) {
    %c0_i32 = arith.constant 0 : i32
    %c0_i32_0 = arith.constant 0 : i32
    %c0_i32_1 = arith.constant 0 : i32
    %c0_i32_2 = arith.constant 0 : i32
    return %c0_i32, %c0_i32_0, %c0_i32_1 : i32, i32, i32
  }
  func.func @transform_2(%arg0: i32) -> (i32, i32, i32, i32) {
    %c0_i32 = arith.constant 0 : i32
    %c0_i32_0 = arith.constant 0 : i32
    %c0_i32_1 = arith.constant 0 : i32
    %c0_i32_2 = arith.constant 0 : i32
    return %arg0, %c0_i32, %c0_i32_0, %c0_i32_1 : i32, i32, i32, i32
  }
}

</mosaic_0001>

<bundles_post_ra>
// kernel: tpu_custom_call.1
= control target key start
LH: loop header
LB: loop body
LE: loop exit
PB: predicated region body
PF: predicated region fallthrough
CT: control target
= control target key end

     0   :  { %7 = vsyncpa [#allocation4], 0  ;;  %s2215_s0 = inlined_call_operand.vmem [shape: f32[2,4,8,64], index: 0, kind: input, shape index: {}]   ;;  %s2216_s1 = inlined_call_operand.vmem [shape: f32[7,128,64], index: 1, kind: input, shape index: {}]   ;;  %s2217_s2 = inlined_call_operand.hbm [shape: f32[2,4,8,64], index: 2, kind: output, shape index: {}]  }
   0x1   :  { %9 = vsyncpa [#allocation4 + $0x1], 0  ;;  %s1671_s9 = smov 0   ;;  %s1673_s10 = smov 0  }
   0x2   :  { %s1675_s11 = smov 0   ;;  %s1677_s12 = smov 0  }
   0x3 LB: > { %s1692_s13 = sadd.s32 4294967295, %s1647_s12   ;;  %s883_s14 = sadd.s32 4294967294, %s1647_s12   ;;  %s1647_s12 = sphi %s1677_s12, %s2223_s12   ;;  %s1643_s11 = sphi %s1675_s11, %s2222_s11   ;;  %s1639_s10 = sphi %s1673_s10, %s2221_s10   ;;  %s1635_s9 = sphi %s1671_s9, %s2220_s9  }
   0x4   : > { %s1696_s15 = sadd.s32 1, %s1647_s12   ;;  %s69_s16 = sadd.s32 1, %s1643_s11 }
   0x5   : > { %s66_s17 = ssub.s32 %s1647_s12, %s1696_s15  ;;  %p79_p0 = scmp.ne.s32.totalorder %s1643_s11, %s1639_s10 }
   0x6   : > { %p67_p1 = scmp.eq.s32.totalorder %s66_s17, 0  ;;  %p80_p2 = scmp.eq.s32.totalorder %s1692_s13, 1 }
   0x7   : > { %p85_p3 = scmp.ne.s32.totalorder %s1639_s10, %s1635_s9  ;;  %p86_p4 = scmp.eq.s32.totalorder %s883_s14, 1 }
   0x8   : > { %s1707_s18 = scalar_select %p67_p1, %s1643_s11, %s69_s16  }
   0x9   : > { %p1709_p5 = por %p80_p2, %p79_p0  ;;  %p1713_p6 = por %p86_p4, %p85_p3 }
   0xa   : > { %p886_p7 = scmp.ge.s32.totalorder %s1647_s12, 1  ;;  %p115_p8 = scmp.lt.s32.totalorder %s1647_s12, 3 }
   0xc   : > { %p116_p9 = pnand %p886_p7, %p115_p8 }
   0xd   : > { %p137_p10 = scmp.lt.s32.totalorder (!%p116_p9), %s1692_s13, 1  ;;  %v890_v0 = vld [vmem:[%s2216_s1 + $0x80] sm:$0xff] (!%p116_p9)  ;;  %v891_v1 = vld [vmem:[%s2216_s1 + $0x88] sm:$0xff] (!%p116_p9)  ;;  %v1649_v2 = vmov (!%p116_p9), 0.0|0.0   ;;  %v892_v6 = vld [vmem:[%s2216_s1 + $0x90] sm:$0xff] (!%p116_p9)  ;;  %v1650_v12 = vmov (!%p116_p9), 0.0  }
   0xe   : > { %119 = sbr.rel (%p116_p9) target bundleno = 517 (0x205), region = 28  ;;  %1357 = vmatprep.subr.bf16.mxu1 (!%p116_p9), %v1649_v2  ;;  %1429 = vmatprep.subr.bf16.mxu0 (!%p116_p9), %v1649_v2  ;;  %v1358_v3 = vpack.c.bf16 (!%p116_p9), %v891_v1, %v890_v0  ;;  %v922_v4 = vld [vmem:[%s2216_s1 + $0x180] sm:$0xff] (!%p116_p9)  ;;  %v923_v5 = vld [vmem:[%s2216_s1 + $0x188] sm:$0xff] (!%p116_p9)  ;;  %v893_v8 = vld [vmem:[%s2216_s1 + $0x98] sm:$0xff] (!%p116_p9)  ;;  %146 = vst [vmem:[#allocation2] sm:$0x7] (!%p116_p9), %v1650_v12 }
   0xf   : > { %v1430_v7 = vpack.c.bf16 (!%p116_p9), %v923_v5, %v922_v4  ;;  %v924_v9 = vld [vmem:[%s2216_s1 + $0x190] sm:$0xff] (!%p116_p9)  ;;  %v925_v10 = vld [vmem:[%s2216_s1 + $0x198] sm:$0xff] (!%p116_p9)  ;;  %v1361_v11 = vpack.c.bf16 (!%p116_p9), %v893_v8, %v892_v6  ;;  %147 = vst [vmem:[#allocation2 + $0xb] sm:$0x7] (!%p116_p9), %v1650_v12  ;;  %vm148_vm0 = vcmask (!%p116_p9), 523264   ;;  %v894_v14 = vld [vmem:[%s2216_s1 + $0xa0] sm:$0xff] (!%p116_p9) }
  0x10   : > { %1359 = vmatpush3.bf16.msra.mxu1 (!%p116_p9), %v1358_v3  ;;  %v1433_v13 = vpack.c.bf16 (!%p116_p9), %v925_v10, %v924_v9  ;;  %v895_v15 = vld [vmem:[%s2216_s1 + $0xa8] sm:$0xff] (!%p116_p9)  ;;  %v926_v16 = vld [vmem:[%s2216_s1 + $0x1a0] sm:$0xff] (!%p116_p9)  ;;  %vm1651_vm1 = vmmov (!%p116_p9), 0   ;;  %v896_v29 = vld [vmem:[%s2216_s1 + $0xb0] sm:$0xff] (!%p116_p9)  ;;  %s1652_s28 = smov (!%p116_p9), 64   ;;  %vm170_vm2 = vcmask (!%p116_p9), 1048064  }
  0x11   : > { %1431 = vmatpush3.bf16.msra.mxu0 (!%p116_p9), %v1430_v7  ;;  %1360 = vmatprep.subr.bf16.mxu1 (!%p116_p9), %v1649_v2  ;;  %v927_v17 = vld [vmem:[%s2216_s1 + $0x1a8] sm:$0xff] (!%p116_p9)  ;;  %v1364_v25 = vpack.c.bf16 (!%p116_p9), %v895_v15, %v894_v14  ;;  %v897_v30 = vld [vmem:[%s2216_s1 + $0xb8] sm:$0xff] (!%p116_p9)  ;;  %v928_v32 = vld [vmem:[%s2216_s1 + $0x1b0] sm:$0xff] (!%p116_p9)  ;;  %s134_s23 = sand.u32 (!%p116_p9), 1, %s1639_s10   ;;  %s992_s25 = sshll.u32 (!%p116_p9), %s1692_s13, 9 }
  0x12   : > { %1432 = vmatprep.subr.bf16.mxu0 (!%p116_p9), %v1649_v2  ;;  %1144 = vmatprep.mubr.msk.f32.mxu1 (!%p116_p9), %vm1651_vm1, %v1650_v12  ;;  %v1436_v28 = vpack.c.bf16 (!%p116_p9), %v927_v17, %v926_v16  ;;  %v929_v33 = vld [vmem:[%s2216_s1 + $0x1b8] sm:$0xff] (!%p116_p9)  ;;  %v1367_v39 = vpack.c.bf16 (!%p116_p9), %v897_v30, %v896_v29  ;;  %v898_v43 = vld [vmem:[%s2216_s1 + $0xc0] sm:$0xff] (!%p116_p9)  ;;  %v899_v44 = vld [vmem:[%s2216_s1 + $0xc8] sm:$0xff] (!%p116_p9)  ;;  %s887_s24 = sshll.u32 (!%p116_p9), %s134_s23, 5  ;;  %s2162_s30 = scalar_lea.hbm (!%p116_p9), %s2217_s2, %s992_s25 }
  0x13   : > { %1249 = vmatprep.mubr.msk.f32.mxu0 (!%p116_p9), %vm1651_vm1, %v1650_v12  ;;  %v1439_v42 = vpack.c.bf16 (!%p116_p9), %v929_v33, %v928_v32  ;;  %v930_v45 = vld [vmem:[%s2216_s1 + $0x1c0] sm:$0xff] (!%p116_p9)  ;;  %v931_v46 = vld [vmem:[%s2216_s1 + $0x1c8] sm:$0xff] (!%p116_p9)  ;;  %v1370_v49 = vpack.c.bf16 (!%p116_p9), %v899_v44, %v898_v43  ;;  %v900_v51 = vld [vmem:[%s2216_s1 + $0xd0] sm:$0xff] (!%p116_p9)  ;;  %s1653_s4 = smov (!%p116_p9), [#allocation3]  }
  0x14   : > { %1362 = vmatpush3.bf16.msra.mxu1 (!%p116_p9), %v1361_v11  ;;  %v1442_v50 = vpack.c.bf16 (!%p116_p9), %v931_v46, %v930_v45  ;;  %v901_v52 = vld [vmem:[%s2216_s1 + $0xd8] sm:$0xff] (!%p116_p9)  ;;  %v932_v53 = vld [vmem:[%s2216_s1 + $0x1d0] sm:$0xff] (!%p116_p9)  ;;  %v902_v57 = vld [vmem:[%s2216_s1 + $0xe0] sm:$0xff] (!%p116_p9)  ;;  %s1589_s5 = sshll.u32 (!%p116_p9), %s1653_s4, 4  ;;  %s1590_s5 = int_to_ptr.vmem [resolvable:$false] %s1589_s5 }
  0x15   : > { %s138_s3 = scalar_select %p137_p10, %s1692_s13, 1  ;;  %1434 = vmatpush3.bf16.msra.mxu0 %v1433_v13  ;;  %1363 = vmatprep.subr.bf16.mxu1 %v1649_v2  ;;  %v933_v54 = vld [vmem:[%s2216_s1 + $0x1d8] sm:$0xff]  ;;  %v1373_v55 = vpack.c.bf16 %v901_v52, %v900_v51  ;;  %v903_v58 = vld [vmem:[%s2216_s1 + $0xe8] sm:$0xff]  ;;  %v934_v59 = vld [vmem:[%s2216_s1 + $0x1e0] sm:$0xff] }
  0x16   : > { %1435 = vmatprep.subr.bf16.mxu0 %v1649_v2  ;;  %v1445_v56 = vpack.c.bf16 %v933_v54, %v932_v53  ;;  %v935_v60 = vld [vmem:[%s2216_s1 + $0x1e8] sm:$0xff]  ;;  %v1376_v61 = vpack.c.bf16 %v903_v58, %v902_v57  ;;  %v904_v63 = vld [vmem:[%s2216_s1 + $0xf0] sm:$0xff]  ;;  %v905_v0 = vld [vmem:[%s2216_s1 + $0xf8] sm:$0xff]  ;;  %s2174_s13 = scalar_lea.sflag [#allocation4], %s134_s23  ;;  %s1591_s6 = scalar_lea.vmem %s1590_s5, 1024 }
  0x17   : > { %s991_s16 = sshll.u32 %s138_s3, 5  ;;  %v1448_v62 = vpack.c.bf16 %v935_v60, %v934_v59  ;;  %v936_v1 = vld [vmem:[%s2216_s1 + $0x1f0] sm:$0xff]  ;;  %v937_v3 = vld [vmem:[%s2216_s1 + $0x1f8] sm:$0xff]  ;;  %v1379_v4 = vpack.c.bf16 %v905_v0, %v904_v63  ;;  %v173_v7 = vld [vmem:[%s2216_s1] sm:$0xff] }
  0x18   : > { %s141_s26 = scalar_lea.vmem %s2215_s0, %s991_s16  ;;  %1365 = vmatpush3.bf16.msra.mxu1 %v1364_v25  ;;  %v1451_v5 = vpack.c.bf16 %v937_v3, %v936_v1  ;;  %v174_v8 = vld [vmem:[%s2216_s1 + $0x8] sm:$0xff]  ;;  %v938_v9 = vld [vmem:[%s2216_s1 + $0x200] sm:$0xff]  ;;  %v175_v14 = vld [vmem:[%s2216_s1 + $0x10] sm:$0xff] }
  0x19   : > { %v1768_v18 = vld [vmem:[%s141_s26] sm:$0xff]  ;;  %v1770_v19 = vld [vmem:[%s141_s26 + $0x8] sm:$0xff]  ;;  %v1772_v20 = vld [vmem:[%s141_s26 + $0x10] sm:$0xff]  ;;  %1437 = vmatpush3.bf16.msra.mxu0 %v1436_v28  ;;  %1366 = vmatprep.subr.bf16.mxu1 %v1649_v2  ;;  %v1382_v11 = vpack.c.bf16 %v174_v8, %v173_v7 }
  0x1a   : > { %v1776_v21 = vld [vmem:[%s141_s26 + $0x18] sm:$0xff]  ;;  %v157_v22 = vsel %vm148_vm0, %v1768_v18, 0.0  ;;  %v158_v23 = vsel %vm148_vm0, %v1770_v19, 0.0  ;;  %v160_v24 = vsel %vm148_vm0, %v1772_v20, 0.0  ;;  %v149_v34 = vsel %vm148_vm0, %v1768_v18, -inf  ;;  %1438 = vmatprep.subr.bf16.mxu0 %v1649_v2  ;;  %v939_v10 = vld [vmem:[%s2216_s1 + $0x208] sm:$0xff] }
  0x1b   : > { %v152_v26 = vsel %vm148_vm0, %v1776_v21, -inf  ;;  %v159_v27 = vadd.f32 %v158_v23, %v157_v22  ;;  %v162_v31 = vsel %vm148_vm0, %v1776_v21, 0.0  ;;  %v150_v35 = vsel %vm148_vm0, %v1770_v19, -inf  ;;  %v176_v15 = vld [vmem:[%s2216_s1 + $0x18] sm:$0xff]  ;;  %v940_v16 = vld [vmem:[%s2216_s1 + $0x210] sm:$0xff]  ;;  %v942_v28 = vld [vmem:[%s2216_s1 + $0x220] sm:$0xff] }
  0x1c   : > { %v151_v37 = vsel %vm148_vm0, %v1772_v20, -inf  ;;  %v153_v38 = vmax.f32 %v149_v34, %v150_v35  ;;  %1368 = vmatpush3.bf16.msra.mxu1 %v1367_v39  ;;  %v1454_v13 = vpack.c.bf16 %v939_v10, %v938_v9  ;;  %v941_v17 = vld [vmem:[%s2216_s1 + $0x218] sm:$0xff]  ;;  %v943_v29 = vld [vmem:[%s2216_s1 + $0x228] sm:$0xff]  ;;  %v179_v32 = vld [vmem:[%s2216_s1 + $0x30] sm:$0xff]  ;;  %s136_s26 = scalar_lea.vmem [#allocation3], %s887_s24 }
  0x1d   : > { %v161_v36 = vadd.f32 %v160_v24, %v159_v27  ;;  %v154_v40 = vmax.f32 %v151_v37, %v152_v26  ;;  %1440 = vmatpush3.bf16.msra.mxu0 %v1439_v42  ;;  %1369 = vmatprep.subr.bf16.mxu1 %v1649_v2  ;;  %v1385_v24 = vpack.c.bf16 %v176_v15, %v175_v14  ;;  %v177_v26 = vld [vmem:[%s2216_s1 + $0x20] sm:$0xff]  ;;  %v178_v27 = vld [vmem:[%s2216_s1 + $0x28] sm:$0xff]  ;;  %v180_v33 = vld [vmem:[%s2216_s1 + $0x38] sm:$0xff]  ;;  %s821_s27 = sshll.u32 %s136_s26, 4  ;;  %s2164_s27 = int_to_ptr.vmem [resolvable:$true] %s821_s27 }
  0x1e   : > { %1441 = vmatprep.subr.bf16.mxu0 %v1649_v2  ;;  %v1457_v25 = vpack.c.bf16 %v941_v17, %v940_v16  ;;  %v1388_v30 = vpack.c.bf16 %v178_v27, %v177_v26  ;;  %v944_v34 = vld [vmem:[%s2216_s1 + $0x230] sm:$0xff]  ;;  %v945_v35 = vld [vmem:[%s2216_s1 + $0x238] sm:$0xff]  ;;  %v182_v39 = vld [vmem:[%s2216_s1 + $0x48] sm:$0xff]  ;;  %s1585_s3 = scalar_lea.vmem %s2164_s27, 512  ;;  %p1592_p0 = scmp.lt.s32.totalorder %s2164_s27, %s1590_s5 }
  0x1f   : > { %v163_v41 = vadd.f32 %v162_v31, %v161_v36  ;;  %v155_v47 = vmax.f32 %v153_v38, %v154_v40  ;;  %v1460_v31 = vpack.c.bf16 %v943_v29, %v942_v28  ;;  %v1391_v36 = vpack.c.bf16 %v180_v33, %v179_v32  ;;  %v181_v38 = vld [vmem:[%s2216_s1 + $0x40] sm:$0xff]  ;;  %v183_v44 = vld [vmem:[%s2216_s1 + $0x50] sm:$0xff]  ;;  %v184_v45 = vld [vmem:[%s2216_s1 + $0x58] sm:$0xff]  ;;  %p1586_p11 = scmp.ne.s32.totalorder %s2164_s27, %s1585_s3  ;;  %p1593_p1 = scmp.lt.s32.totalorder %s1591_s6, %s1585_s3 }
  0x20   : > { %1371 = vmatpush3.bf16.msra.mxu1 %v1370_v49  ;;  %v1463_v37 = vpack.c.bf16 %v945_v35, %v944_v34  ;;  %v946_v40 = vld [vmem:[%s2216_s1 + $0x240] sm:$0xff]  ;;  %v1394_v42 = vpack.c.bf16 %v182_v39, %v181_v38  ;;  %v948_v46 = vld [vmem:[%s2216_s1 + $0x250] sm:$0xff]  ;;  %v186_v51 = vld [vmem:[%s2216_s1 + $0x68] sm:$0xff] }
  0x21   : > { %v165_v48 = vmul.f32 0.25, %v163_v41  ;;  %156 = vst.msk [vmem:[#allocation2 + $0x3] sm:$0xff] %vm148_vm0, %v155_v47  ;;  %1443 = vmatpush3.bf16.msra.mxu0 %v1442_v50  ;;  %1372 = vmatprep.subr.bf16.mxu1 %v1649_v2  ;;  %v947_v41 = vld [vmem:[%s2216_s1 + $0x248] sm:$0xff]  ;;  %v949_v47 = vld [vmem:[%s2216_s1 + $0x258] sm:$0xff]  ;;  %v185_v50 = vld [vmem:[%s2216_s1 + $0x60] sm:$0xff]  ;;  %p1587_p12 = pnand %p1586_p11, %p1709_p5  ;;  %p1594_p2 = por %p1593_p1, %p1592_p0 }
  0x22   : > { %1444 = vmatprep.subr.bf16.mxu0 %v1649_v2  ;;  %v1466_v43 = vpack.c.bf16 %v947_v41, %v946_v40  ;;  %v1469_v49 = vpack.c.bf16 %v949_v47, %v948_v46  ;;  %v950_v52 = vld [vmem:[%s2216_s1 + $0x260] sm:$0xff]  ;;  %v951_v53 = vld [vmem:[%s2216_s1 + $0x268] sm:$0xff]  ;;  %v1400_v54 = vpack.c.bf16 %v186_v51, %v185_v50  ;;  %v188_v57 = vld [vmem:[%s2216_s1 + $0x78] sm:$0xff] }
  0x23   : > { %167 = vrot.lane.b32.xlu0 %v165_v48, %s1652_s28  ;;  %v1397_v48 = vpack.c.bf16 %v184_v45, %v183_v44  ;;  %v952_v58 = vld [vmem:[%s2216_s1 + $0x270] sm:$0xff]  ;;  %v953_v59 = vld [vmem:[%s2216_s1 + $0x278] sm:$0xff]  ;;  %v907_v63 = vld [vmem:[%s2216_s1 + $0x108] sm:$0xff]  ;;  %p1588_p13 = pneg %p1587_p12 }
  0x24   : > { %1374 = vmatpush3.bf16.msra.mxu1 %v1373_v55  ;;  %v1472_v55 = vpack.c.bf16 %v951_v53, %v950_v52  ;;  %v954_v0 = vld [vmem:[%s2216_s1 + $0x280] sm:$0xff]  ;;  %v955_v1 = vld [vmem:[%s2216_s1 + $0x288] sm:$0xff]  ;;  %v956_v7 = vld [vmem:[%s2216_s1 + $0x290] sm:$0xff] }
  0x25   : > { %1446 = vmatpush3.bf16.msra.mxu0 %v1445_v56  ;;  %1375 = vmatprep.subr.bf16.mxu1 %v1649_v2  ;;  %v187_v56 = vld [vmem:[%s2216_s1 + $0x70] sm:$0xff]  ;;  %v957_v8 = vld [vmem:[%s2216_s1 + $0x298] sm:$0xff]  ;;  %v910_v14 = vld [vmem:[%s2216_s1 + $0x120] sm:$0xff]  ;;  %p1595_p3 = pnand %p1594_p2, %p1588_p13 }
  0x26   : > { %1447 = vmatprep.subr.bf16.mxu0 %v1649_v2  ;;  %v1403_v60 = vpack.c.bf16 %v188_v57, %v187_v56  ;;  %v911_v15 = vld [vmem:[%s2216_s1 + $0x128] sm:$0xff]  ;;  %v958_v16 = vld [vmem:[%s2216_s1 + $0x2a0] sm:$0xff]  ;;  %v960_v26 = vld [vmem:[%s2216_s1 + $0x2b0] sm:$0xff] }
  0x27   : > { %v959_v17 = vld [vmem:[%s2216_s1 + $0x2a8] sm:$0xff]  ;;  %v961_v27 = vld [vmem:[%s2216_s1 + $0x2b8] sm:$0xff]  ;;  %v962_v32 = vld [vmem:[%s2216_s1 + $0x2c0] sm:$0xff] }
  0x28   : > { %1377 = vmatpush3.bf16.msra.mxu1 %v1376_v61  ;;  %v1475_v61 = vpack.c.bf16 %v953_v59, %v952_v58  ;;  %v1487_v29 = vpack.c.bf16 %v961_v27, %v960_v26  ;;  %v963_v33 = vld [vmem:[%s2216_s1 + $0x2c8] sm:$0xff]  ;;  %v964_v38 = vld [vmem:[%s2216_s1 + $0x2d0] sm:$0xff]  ;;  %v965_v39 = vld [vmem:[%s2216_s1 + $0x2d8] sm:$0xff] }
  0x29   : > { %1449 = vmatpush3.bf16.msra.mxu0 %v1448_v62  ;;  %1378 = vmatprep.subr.bf16.mxu1 %v1649_v2  ;;  %v906_v62 = vld [vmem:[%s2216_s1 + $0x100] sm:$0xff]  ;;  %v1490_v35 = vpack.c.bf16 %v963_v33, %v962_v32  ;;  %v1493_v41 = vpack.c.bf16 %v965_v39, %v964_v38  ;;  %v967_v45 = vld [vmem:[%s2216_s1 + $0x2e8] sm:$0xff]  ;;  %v968_v50 = vld [vmem:[%s2216_s1 + $0x2f0] sm:$0xff] }
  0x2a   : > { %1450 = vmatprep.subr.bf16.mxu0 %v1649_v2  ;;  %v1406_v3 = vpack.c.bf16 %v907_v63, %v906_v62  ;;  %v966_v44 = vld [vmem:[%s2216_s1 + $0x2e0] sm:$0xff]  ;;  %v969_v51 = vld [vmem:[%s2216_s1 + $0x2f8] sm:$0xff]  ;;  %v972_v57 = vld [vmem:[%s2216_s1 + $0x310] sm:$0xff] }
  0x2b   : > { %v1496_v47 = vpack.c.bf16 %v967_v45, %v966_v44  ;;  %v1499_v53 = vpack.c.bf16 %v969_v51, %v968_v50  ;;  %v973_v58 = vld [vmem:[%s2216_s1 + $0x318] sm:$0xff]  ;;  %v974_v62 = vld [vmem:[%s2216_s1 + $0x320] sm:$0xff]  ;;  %v975_v63 = vld [vmem:[%s2216_s1 + $0x328] sm:$0xff] }
  0x2c   : > { %1380 = vmatpush3.bf16.msra.mxu1 %v1379_v4  ;;  %v1478_v4 = vpack.c.bf16 %v955_v1, %v954_v0  ;;  %v1508_v0 = vpack.c.bf16 %v975_v63, %v974_v62  ;;  %v976_v1 = vld [vmem:[%s2216_s1 + $0x330] sm:$0xff] }
  0x2d   : > { %1452 = vmatpush3.bf16.msra.mxu0 %v1451_v5  ;;  %1381 = vmatprep.subr.bf16.mxu1 %v1649_v2  ;;  %v908_v5 = vld [vmem:[%s2216_s1 + $0x110] sm:$0xff] }
  0x2e   : > { %1453 = vmatprep.subr.bf16.mxu0 %v1649_v2 }
  0x95   : > { %v168_v6 = vpop.permute.xlu0 %167 }
  0x96   : > { %171 = vst.msk [vmem:[#allocation2 + $0x3] sm:$0xff] %vm170_vm2, %v168_v6  ;;  %v909_v6 = vld [vmem:[%s2216_s1 + $0x118] sm:$0xff] }
  0x9d   : > { %v189_v22 = vld [vmem:[#allocation2 + $0x1] sm:$0xff] }
  0x9e   : > { %v436_v23 = vld [vmem:[#allocation2 + $0x3] sm:$0xff]  ;;  %1145 = vmatmul.mubr.f32.vlgmr.msra.gmra.mrb[0].mxu1 %v189_v22  ;;  %v1412_v22 = vpack.c.bf16 %v911_v15, %v910_v14  ;;  %v984_v14 = vld [vmem:[%s2216_s1 + $0x370] sm:$0xff]  ;;  %v985_v15 = vld [vmem:[%s2216_s1 + $0x378] sm:$0xff] }
  0x9f   : > { %1250 = vmatmul.mubr.f32.vlgmr.msra.gmra.mrb[0].mxu0 %v436_v23  ;;  %1383 = vmatpush3.bf16.msra.mxu1 %v1382_v11  ;;  %v172_v9 = vld [vmem:[#allocation2] sm:$0xff]  ;;  %v1409_v11 = vpack.c.bf16 %v909_v6, %v908_v5  ;;  %v1484_v23 = vpack.c.bf16 %v959_v17, %v958_v16  ;;  %v979_v5 = vld [vmem:[%s2216_s1 + $0x348] sm:$0xff]  ;;  %v1523_v16 = vpack.c.bf16 %v985_v15, %v984_v14 }
  0xa0   : > { %1455 = vmatpush3.bf16.msra.mxu0 %v1454_v13  ;;  %1384 = vmatprep.subr.bf16.mxu1 %v1649_v2  ;;  %v525_v10 = vld [vmem:[#allocation2 + $0x4] sm:$0xff]  ;;  %v1481_v13 = vpack.c.bf16 %v957_v8, %v956_v7  ;;  %v980_v7 = vld [vmem:[%s2216_s1 + $0x350] sm:$0xff]  ;;  %v981_v8 = vld [vmem:[%s2216_s1 + $0x358] sm:$0xff] }
  0xa1   : > { %1456 = vmatprep.subr.bf16.mxu0 %v1649_v2  ;;  %1179 = vmatprep.mubr.msk.f32.mxu1 %vm1651_vm1, %v1650_v12  ;;  %v347_v59 = vld [vmem:[#allocation2 + $0x2] sm:$0xff] }
  0xa2   : > { %1284 = vmatprep.mubr.msk.f32.mxu0 %vm1651_vm1, %v1650_v12  ;;  %v703_v17 = vld [vmem:[#allocation2 + $0x6] sm:$0xff] }
  0xa3   : > { %1386 = vmatpush3.bf16.msra.mxu1 %v1385_v24  ;;  %v912_v24 = vld [vmem:[%s2216_s1 + $0x130] sm:$0xff] }
  0xa4   : > { %1458 = vmatpush3.bf16.msra.mxu0 %v1457_v25  ;;  %1387 = vmatprep.subr.bf16.mxu1 %v1649_v2  ;;  %v913_v25 = vld [vmem:[%s2216_s1 + $0x138] sm:$0xff] }
  0xa5   : > { %1459 = vmatprep.subr.bf16.mxu0 %v1649_v2  ;;  %v1415_v28 = vpack.c.bf16 %v913_v25, %v912_v24 }
  0xa7   : > { %1389 = vmatpush3.bf16.msra.mxu1 %v1388_v30  ;;  %v914_v30 = vld [vmem:[%s2216_s1 + $0x140] sm:$0xff] }
  0xa8   : > { %1461 = vmatpush3.bf16.msra.mxu0 %v1460_v31  ;;  %1390 = vmatprep.subr.bf16.mxu1 %v1649_v2  ;;  %v915_v31 = vld [vmem:[%s2216_s1 + $0x148] sm:$0xff] }
  0xa9   : > { %1462 = vmatprep.subr.bf16.mxu0 %v1649_v2  ;;  %v1418_v34 = vpack.c.bf16 %v915_v31, %v914_v30 }
  0xab   : > { %1392 = vmatpush3.bf16.msra.mxu1 %v1391_v36  ;;  %v916_v36 = vld [vmem:[%s2216_s1 + $0x150] sm:$0xff] }
  0xac   : > { %1464 = vmatpush3.bf16.msra.mxu0 %v1463_v37  ;;  %1393 = vmatprep.subr.bf16.mxu1 %v1649_v2  ;;  %v917_v37 = vld [vmem:[%s2216_s1 + $0x158] sm:$0xff] }
  0xad   : > { %1465 = vmatprep.subr.bf16.mxu0 %v1649_v2  ;;  %v1421_v40 = vpack.c.bf16 %v917_v37, %v916_v36 }
  0xaf   : > { %1395 = vmatpush3.bf16.msra.mxu1 %v1394_v42  ;;  %v918_v42 = vld [vmem:[%s2216_s1 + $0x160] sm:$0xff] }
  0xb0   : > { %1467 = vmatpush3.bf16.msra.mxu0 %v1466_v43  ;;  %1396 = vmatprep.subr.bf16.mxu1 %v1649_v2  ;;  %v919_v43 = vld [vmem:[%s2216_s1 + $0x168] sm:$0xff] }
  0xb1   : > { %1468 = vmatprep.subr.bf16.mxu0 %v1649_v2  ;;  %v1424_v46 = vpack.c.bf16 %v919_v43, %v918_v42 }
  0xb3   : > { %1398 = vmatpush3.bf16.msra.mxu1 %v1397_v48  ;;  %v920_v48 = vld [vmem:[%s2216_s1 + $0x170] sm:$0xff] }
  0xb4   : > { %1470 = vmatpush3.bf16.msra.mxu0 %v1469_v49  ;;  %1399 = vmatprep.subr.bf16.mxu1 %v1649_v2  ;;  %v921_v49 = vld [vmem:[%s2216_s1 + $0x178] sm:$0xff] }
  0xb5   : > { %1471 = vmatprep.subr.bf16.mxu0 %v1649_v2  ;;  %v1427_v52 = vpack.c.bf16 %v921_v49, %v920_v48 }
  0xb7   : > { %1401 = vmatpush3.bf16.msra.mxu1 %v1400_v54  ;;  %v970_v54 = vld [vmem:[%s2216_s1 + $0x300] sm:$0xff] }
  0xb8   : > { %1473 = vmatpush3.bf16.msra.mxu0 %v1472_v55  ;;  %1402 = vmatprep.subr.bf16.mxu1 %v1649_v2  ;;  %v971_v55 = vld [vmem:[%s2216_s1 + $0x308] sm:$0xff] }
  0xb9   : > { %1474 = vmatprep.subr.bf16.mxu0 %v1649_v2  ;;  %v1502_v56 = vpack.c.bf16 %v971_v55, %v970_v54 }
  0xbb   : > { %1404 = vmatpush3.bf16.msra.mxu1 %v1403_v60  ;;  %v614_v60 = vld [vmem:[#allocation2 + $0x5] sm:$0xff] }
  0xbc   : > { %1476 = vmatpush3.bf16.msra.mxu0 %v1475_v61  ;;  %1405 = vmatprep.subr.bf16.mxu1 %v1649_v2  ;;  %v1505_v61 = vpack.c.bf16 %v973_v58, %v972_v57 }
  0xbd   : > { %1477 = vmatprep.subr.bf16.mxu0 %v1649_v2 }
  0xbe   : > { %1180 = vmatmul.mubr.f32.vlgmr.msra.gmra.mrb[0].mxu1 %v172_v9  ;;  %v1517_v9 = vpack.c.bf16 %v981_v8, %v980_v7 }
  0xbf   : > { %1285 = vmatmul.mubr.f32.vlgmr.msra.gmra.mrb[0].mxu0 %v525_v10  ;;  %1407 = vmatpush3.bf16.msra.mxu1 %v1406_v3  ;;  %v982_v10 = vld [vmem:[%s2216_s1 + $0x360] sm:$0xff] }
  0xc0   : > { %1479 = vmatpush3.bf16.msra.mxu0 %v1478_v4  ;;  %1408 = vmatprep.subr.bf16.mxu1 %v1649_v2  ;;  %v978_v4 = vld [vmem:[%s2216_s1 + $0x340] sm:$0xff] }
  0xc1   : > { %1480 = vmatprep.subr.bf16.mxu0 %v1649_v2  ;;  %1214 = vmatprep.mubr.msk.f32.mxu1 %vm1651_vm1, %v1650_v12  ;;  %v1514_v6 = vpack.c.bf16 %v979_v5, %v978_v4 }
  0xc2   : > { %1319 = vmatprep.mubr.msk.f32.mxu0 %vm1651_vm1, %v1650_v12 }
  0xc3   : > { %1410 = vmatpush3.bf16.msra.mxu1 %v1409_v11  ;;  %v983_v11 = vld [vmem:[%s2216_s1 + $0x368] sm:$0xff] }
  0xc4   : > { %1482 = vmatpush3.bf16.msra.mxu0 %v1481_v13  ;;  %1411 = vmatprep.subr.bf16.mxu1 %v1649_v2  ;;  %v1520_v13 = vpack.c.bf16 %v983_v11, %v982_v10 }
  0xc5   : > { %1483 = vmatprep.subr.bf16.mxu0 %v1649_v2 }
  0xc7   : > { %1413 = vmatpush3.bf16.msra.mxu1 %v1412_v22 }
  0xc8   : > { %1485 = vmatpush3.bf16.msra.mxu0 %v1484_v23  ;;  %1414 = vmatprep.subr.bf16.mxu1 %v1649_v2 }
  0xc9   : > { %1486 = vmatprep.subr.bf16.mxu0 %v1649_v2 }
  0xcb   : > { %1416 = vmatpush3.bf16.msra.mxu1 %v1415_v28 }
  0xcc   : > { %1488 = vmatpush3.bf16.msra.mxu0 %v1487_v29  ;;  %1417 = vmatprep.subr.bf16.mxu1 %v1649_v2 }
  0xcd   : > { %1489 = vmatprep.subr.bf16.mxu0 %v1649_v2 }
  0xcf   : > { %1419 = vmatpush3.bf16.msra.mxu1 %v1418_v34 }
  0xd0   : > { %1491 = vmatpush3.bf16.msra.mxu0 %v1490_v35  ;;  %1420 = vmatprep.subr.bf16.mxu1 %v1649_v2 }
  0xd1   : > { %1492 = vmatprep.subr.bf16.mxu0 %v1649_v2 }
  0xd3   : > { %1422 = vmatpush3.bf16.msra.mxu1 %v1421_v40 }
  0xd4   : > { %1494 = vmatpush3.bf16.msra.mxu0 %v1493_v41  ;;  %1423 = vmatprep.subr.bf16.mxu1 %v1649_v2 }
  0xd5   : > { %1495 = vmatprep.subr.bf16.mxu0 %v1649_v2 }
  0xd7   : > { %1425 = vmatpush3.bf16.msra.mxu1 %v1424_v46 }
  0xd8   : > { %1497 = vmatpush3.bf16.msra.mxu0 %v1496_v47  ;;  %1426 = vmatprep.subr.bf16.mxu1 %v1649_v2 }
  0xd9   : > { %1498 = vmatprep.subr.bf16.mxu0 %v1649_v2 }
  0xdb   : > { %1428 = vmatpush3.bf16.msra.mxu1 %v1427_v52 }
  0xdc   : > { %1500 = vmatpush3.bf16.msra.mxu0 %v1499_v53 }
  0xdd   : > { %1501 = vmatprep.subr.bf16.mxu0 %v1649_v2 }
  0xde   : > { %1215 = vmatmul.mubr.f32.vlgmr.msra.gmra.mrb[0].mxu1 %v347_v59 }
  0xdf   : > { %1320 = vmatmul.mubr.f32.vlgmr.msra.gmra.mrb[0].mxu0 %v614_v60 }
  0xe0   : > { %1503 = vmatpush3.bf16.msra.mxu0 %v1502_v56  ;;  %1354 = vmatprep.mubr.msk.f32.mxu0 %vm1651_vm1, %v1650_v12  ;;  %v977_v12 = vld [vmem:[%s2216_s1 + $0x338] sm:$0xff] }
  0xe1   : > { %1504 = vmatprep.subr.bf16.mxu0 %v1649_v2  ;;  %v1511_v3 = vpack.c.bf16 %v977_v12, %v976_v1 }
  0xe4   : > { %1506 = vmatpush3.bf16.msra.mxu0 %v1505_v61 }
  0xe5   : > { %1507 = vmatprep.subr.bf16.mxu0 %v1649_v2 }
  0xe8   : > { %1509 = vmatpush3.bf16.msra.mxu0 %v1508_v0 }
  0xe9   : > { %1510 = vmatprep.subr.bf16.mxu0 %v1649_v2 }
  0xec   : > { %1512 = vmatpush3.bf16.msra.mxu0 %v1511_v3 }
  0xed   : > { %1513 = vmatprep.subr.bf16.mxu0 %v1649_v2 }
  0xf0   : > { %1515 = vmatpush3.bf16.msra.mxu0 %v1514_v6 }
  0xf1   : > { %1516 = vmatprep.subr.bf16.mxu0 %v1649_v2 }
  0xf4   : > { %1518 = vmatpush3.bf16.msra.mxu0 %v1517_v9 }
  0xf5   : > { %1519 = vmatprep.subr.bf16.mxu0 %v1649_v2 }
  0xf8   : > { %1521 = vmatpush3.bf16.msra.mxu0 %v1520_v13 }
  0xf9   : > { %1522 = vmatprep.subr.bf16.mxu0 %v1649_v2 }
  0xfc   : > { %1524 = vmatpush3.bf16.msra.mxu0 %v1523_v16 }
  0xff   : > { %1355 = vmatmul.mubr.f32.vlgmr.msra.gmra.mrb[0].mxu0 %v703_v17 }
 0x1b1   : > { %v431_v22 = vpop.f32.mrb[0].mxu1 }
 0x1b2   : > { %v1216_v23 = vpop.f32.mrb[1].mxu1 }
 0x1d2   : > { %v787_v24 = vpop.f32.mrb[0].mxu0 }
 0x1d3   : > { %v1525_v25 = vadd.f32 %v787_v24, %v431_v22  ;;  %v1356_v26 = vpop.f32.mrb[1].mxu0 }
 0x1d5   : > { %v793_v27 = vmax.f32 %v1525_v25, 0.0 }
 0x1d7   : > { %v794_v28 = vsub.f32 0.0, %v793_v27 }
 0x1d9   : > { %v795_v29 = vmul.f32 1.442695, %v794_v28 }
 0x1db   : > { %1581 = vpow2.f32 %v795_v29 }
 0x1e5   : > { %v1582_v30 = vpop.eup %1581 }
 0x1e6   : > { %v797_v31 = vadd.f32 1.0, %v1582_v30 }
 0x1e8   : > { %1583 = vrcp.f32 %v797_v31 }
 0x1f2   : > { %v1584_v2 = vpop.eup %1583 }
 0x1f3   : > { %v799_v32 = vmul.f32 %v1584_v2, %v1768_v18  ;;  %v800_v33 = vmul.f32 %v1584_v2, %v1770_v19  ;;  %v801_v34 = vmul.f32 %v1584_v2, %v1772_v20  ;;  %v802_v35 = vmul.f32 %v1584_v2, %v1776_v21 }
 0x1f5   : > { %803 = vst.msk [vmem:[%s136_s26] sm:$0xff] %vm148_vm0, %v799_v32  ;;  %804 = vst.msk [vmem:[%s136_s26 + $0x8] sm:$0xff] %vm148_vm0, %v800_v33 }
 0x1f6   : > { %805 = vst.msk [vmem:[%s136_s26 + $0x10] sm:$0xff] %vm148_vm0, %v801_v34  ;;  %806 = vst.msk [vmem:[%s136_s26 + $0x18] sm:$0xff] %vm148_vm0, %v802_v35 }
 0x1f7   : > { %1598 = shalt.err (!%p1595_p3)
}
 0x1f8   : > { %s1599_s7 = scalar_lea.hbm %s2162_s30, 512  ;;  %s1603_s16 = scalar_lea.hbm %s2217_s2, 1024 }
 0x1f9   : > { %p1600_p4 = scmp.ne.s32.totalorder %s2162_s30, %s1599_s7  ;;  %p1604_p9 = scmp.lt.u32.totalorder %s2162_s30, %s2217_s2 }
 0x1fa   : > { %p1605_p10 = scmp.lt.u32.totalorder %s1603_s16, %s1599_s7  ;;  %p1607_p12 = scmp.lt.u32.totalorder %s1599_s7, %s2162_s30 }
 0x1fb   : > { %p1601_p7 = pnand %p1600_p4, %p1709_p5 }
 0x1fc   : > { %p1606_p11 = por %p1605_p10, %p1604_p9 }
 0x1fd   : > { %p1602_p8 = pneg %p1601_p7 }
 0x1fe   : > { %p1608_p13 = por %p1607_p12, %p1606_p11 }
 0x200   : > { %p1609_p0 = pnand %p1608_p13, %p1602_p8 }
 0x202   : > { %1612 = shalt.err (!%p1609_p0)
}
 0x203   : > { %s1654_s22 = smov 128   ;;  %s1655_s23 = smov 8  }
 0x204   : > { %1536 = dma.vmem_to_hbm [thread:$0]  (%p1709_p5), %s2164_s27, 512, %s2162_s30, %s2174_s13, %s1654_s22, %s1654_s22, %s1655_s23  }
 0x205 PF: > { %p1542_p1 = scmp.ge.s32.totalorder %s1647_s12, 2  ;;  %s836_s24 = sand.u32 1, %s1635_s9  }
 0x206   : > { %s837_s25 = scalar_lea.sflag [#allocation4], %s836_s24 }
 0x207   : > { %p1539_p2 = pnand %p1542_p1, %p1713_p6 }
 0x209   : > { %1630 = dma.done.wait (!%p1539_p2), %s837_s25, 512  }
 0x20a   : > { %1632 = vsyncadd (!%p1539_p2), %s837_s25, 4294966784  ;;  %p12_p3 = scmp.ge.s32.totalorder %s1696_s15, 4   ;;  %s2220_s9 = smov %s1639_s10 }
 0x20b   : > { %s2221_s10 = smov %s1643_s11  ;;  %s2222_s11 = smov %s1707_s18 }
 0x20c   : > { %s2223_s12 = smov %s1696_s15  ;;  %14 = sbr.rel (!%p12_p3) target bundleno = 3 (0x3), region = 69 }
 0x213   :  { %842 = vsyncpa [#allocation4], 1 }
 0x214   :  { %844 = vsyncpa [#allocation4 + $0x1], 1 }

</bundles_post_ra>
